<compile_context>
chip_gen: v5e
topology: v5e:2x2
jax: 0.10.0
libtpu: 0.0.40
codegen_flags: <defaults>
</compile_context>

<pallas_src>
import jax
import jax.numpy as jnp
from jax.experimental import pallas as pl
from jax.experimental.pallas import tpu as pltpu


def _tta_keypoints_kernel(x_ref, w_ref, b_ref, o_ref):
    """One K-tile of the merged-weight matmul.

    x: (B, tk), w: (tk, P) slice of the pre-merged weight, b: (1, P).
    Output block is resident across the K grid axis and used as the accumulator.
    """
    k = pl.program_id(0)

    @pl.when(k == 0)
    def _():
        # Initialize the accumulator with the (already merged) bias.
        o_ref[...] = jnp.broadcast_to(b_ref[...], o_ref.shape)

    o_ref[...] += jnp.dot(x_ref[...], w_ref[...],
                          preferred_element_type=jnp.float32)


def prepare_keypoints_tta_params(weight, bias, image_shape):
    """Fold HorizontalFlip TTA + keypoint de-aug + mean merge into one (D, P)
    weight and (1, P) bias.  Call ONCE per model; reuse across forward calls.

    weight: (C*H*W, P) with output columns [x1, y1, x2, y2, ...]; bias: (P,).
    """
    _, C, H, Wimg = image_shape
    D = C * H * Wimg
    P = weight.shape[1]
    assert weight.shape[0] == D, "weight rows must equal flattened image size"
    assert P % 2 == 0, "output columns must alternate x1,y1,x2,y2,..."

    weight = weight.astype(jnp.float32)
    bias = bias.astype(jnp.float32)

    # hflip of an NCHW image == static permutation of the flattened feature
    # index (reverse within each (c, h) row of length Wimg), so it folds into W.
    w_flip = weight.reshape(C, H, Wimg, P)[:, :, ::-1, :].reshape(D, P)

    # Per-column de-aug of the flipped branch, expressed in pixel space (the
    # /img_w, /img_h normalization and final *img_w, *img_h cancel under the
    # linear mean merge):
    #   x columns: img_w - x   (sign = -1, off = img_w)
    #   y columns: y           (sign = +1, off = 0)
    is_x = (jnp.arange(P) % 2) == 0
    sign = jnp.where(is_x, -1.0, 1.0).astype(jnp.float32)
    off = jnp.where(is_x, float(Wimg), 0.0).astype(jnp.float32)

    # mean over {identity, hflip}:
    #   out = 0.5*((xW + b) + sign*(xW_flip + b) + off)
    #       = x @ [0.5*(W + W_flip*sign)] + 0.5*((1+sign)*b + off)
    w_merged = 0.5 * (weight + w_flip * sign[None, :])
    b_merged = (0.5 * ((1.0 + sign) * bias + off)).reshape(1, P)
    return w_merged, b_merged


def keypoints_tta_forward(image, w_merged, b_merged):
    """image: (B, C, H, W) f32; w_merged: (D, P); b_merged: (1, P).

    Returns (B, P) merged keypoint predictions, matching
    KeypointsTTAWrapper(model=linear, transforms=[HorizontalFlip()],
                        merge_mode='mean', scaled=False).forward(image).
    """
    B, C, H, Wimg = image.shape
    D = C * H * Wimg
    P = w_merged.shape[1]
    assert w_merged.shape == (D, P)
    assert b_merged.shape == (1, P)

    x = image.reshape(B, D).astype(jnp.float32)

    # K-tile the reduction axis (pipelines weight DMA vs MXU when D is large);
    # falls back to a single full-extent block for small / indivisible D.
    tk = 512 if (D > 512 and D % 512 == 0) else D
    grid = (D // tk,)

    cost = pl.CostEstimate(
        flops=2 * B * D * P,
        transcendentals=0,
        bytes_accessed=(x.size + w_merged.size + b_merged.size + B * P) * 4,
    )

    grid_spec = pltpu.PrefetchScalarGridSpec(
        num_scalar_prefetch=0,
        grid=grid,
        in_specs=[
            pl.BlockSpec((B, tk), lambda k: (0, k)),     # activations K-slice
            pl.BlockSpec((tk, P), lambda k: (k, 0)),     # merged-weight K-slice
            pl.BlockSpec((1, P), lambda k: (0, 0)),      # merged bias
        ],
        out_specs=pl.BlockSpec((B, P), lambda k: (0, 0)),  # resident accumulator
    )

    return pl.pallas_call(
        _tta_keypoints_kernel,
        out_shape=jax.ShapeDtypeStruct((B, P), jnp.float32),
        grid_spec=grid_spec,
        compiler_params=pltpu.CompilerParams(
            dimension_semantics=("arbitrary",)),   # reduction axis
        cost_estimate=cost,
    )(x, w_merged, b_merged)


def _reference_forward(image, weight, bias):
    """Pure-JAX mirror of the PyTorch KeypointsTTAWrapper forward."""
    B, C, H, Wimg = image.shape
    D = C * H * Wimg
    P = weight.shape[1]
    K = P // 2

    def model(img):
        return img.reshape(B, D) @ weight + bias

    acc = None
    variants = [(image, False), (image[..., ::-1], True)]
    for aug_img, flipped in variants:
        out = model(aug_img).reshape(B, K, 2)
        out = out.at[..., 0].divide(Wimg)
        out = out.at[..., 1].divide(H)
        if flipped:
            out = out.at[..., 0].set(1.0 - out[..., 0])
        acc = out if acc is None else acc + out
    res = acc / len(variants)
    res = res.at[..., 0].multiply(Wimg)
    res = res.at[..., 1].multiply(H)
    return res.reshape(B, -1)


if __name__ == "__main__":
    key = jax.random.PRNGKey(0)
    k_img, k_w, k_b = jax.random.split(key, 3)

    B, C, H, W = 2, 4, 16, 16
    K = 8                       # number of keypoints -> output (B, 2K)
    D = C * H * W
    P = 2 * K

    image = jax.random.normal(k_img, (B, C, H, W), dtype=jnp.float32)
    weight = 0.02 * jax.random.normal(k_w, (D, P), dtype=jnp.float32)
    bias = 0.1 * jax.random.normal(k_b, (P,), dtype=jnp.float32)

    # Weight prep done once per model (hoisted out of the per-call hot path).
    w_merged, b_merged = prepare_keypoints_tta_params(weight, bias, image.shape)
    w_merged, b_merged = jax.block_until_ready((w_merged, b_merged))

    out = keypoints_tta_forward(image, w_merged, b_merged)
    out = jax.block_until_ready(out)

    ref = _reference_forward(image, weight, bias)
    assert out.shape == (B, P)
    max_err = float(jnp.max(jnp.abs(out - ref)))
    assert jnp.allclose(out, ref, atol=1e-4, rtol=1e-4), f"max abs err {max_err}"

    print("KERNEL_OK")
</pallas_src>

<mosaic_0001>
module attributes {stable_mosaic.version = 11 : i64} {
  func.func @_tta_keypoints_kernel(%arg0: i32, %arg1: memref<2x512xf32, #tpu.memory_space<vmem>>, %arg2: memref<512x16xf32, #tpu.memory_space<vmem>>, %arg3: memref<1x16xf32, #tpu.memory_space<vmem>>, %arg4: memref<2x16xf32, #tpu.memory_space<vmem>>) attributes {dimension_semantics = [#tpu.dimension_semantics<arbitrary>], iteration_bounds = array<i64: 2>, scalar_prefetch = 0 : i64, scratch_operands = 0 : i64, tpu.core_type = #tpu.core_type<tc>, window_params = [{transform_indices = @transform_0, window_bounds = array<i64: 2, 512>}, {transform_indices = @transform_1, window_bounds = array<i64: 512, 16>}, {pipeline_mode = #tpu.pipeline_mode<synchronous>, transform_indices = @transform_2, window_bounds = array<i64: 1, 16>}, {pipeline_mode = #tpu.pipeline_mode<synchronous>, transform_indices = @transform_3, window_bounds = array<i64: 2, 16>}]} {
    %c0_i32 = arith.constant 0 : i32
    %0 = arith.cmpi eq, %arg0, %c0_i32 : i32
    %1 = arith.extui %0 : i1 to i32
    %c0_i32_0 = arith.constant 0 : i32
    %2 = arith.cmpi ne, %1, %c0_i32_0 : i32
    scf.if %2 {
      %c0_8 = arith.constant 0 : index
      %c0_9 = arith.constant 0 : index
      %9 = vector.load %arg3[%c0_8, %c0_9] : memref<1x16xf32, #tpu.memory_space<vmem>>, vector<1x16xf32>
      %10 = vector.shape_cast %9 : vector<1x16xf32> to vector<1x16xf32>
      %11 = vector.broadcast %10 : vector<1x16xf32> to vector<2x16xf32>
      %c0_10 = arith.constant 0 : index
      %c0_11 = arith.constant 0 : index
      %12 = vector.load %arg4[%c0_10, %c0_11] : memref<2x16xf32, #tpu.memory_space<vmem>>, vector<2x16xf32>
      tpu.vector_store %arg4[%c0_10, %c0_11], %11 {strides = array<i32>} : memref<2x16xf32, #tpu.memory_space<vmem>>, vector<2x16xf32>,
    } else {
    }
    %c0 = arith.constant 0 : index
    %c0_1 = arith.constant 0 : index
    %3 = vector.load %arg4[%c0, %c0_1] : memref<2x16xf32, #tpu.memory_space<vmem>>, vector<2x16xf32>
    %c0_2 = arith.constant 0 : index
    %c0_3 = arith.constant 0 : index
    %4 = vector.load %arg1[%c0_2, %c0_3] : memref<2x512xf32, #tpu.memory_space<vmem>>, vector<2x512xf32>
    %c0_4 = arith.constant 0 : index
    %c0_5 = arith.constant 0 : index
    %5 = vector.load %arg2[%c0_4, %c0_5] : memref<512x16xf32, #tpu.memory_space<vmem>>, vector<512x16xf32>
    %cst = arith.constant dense<0.000000e+00> : vector<2x16xf32>
    %6 = tpu.matmul %4, %5, %cst {dimension_numbers = #tpu.dot_dimension_numbers<[1], [0], [0], [1], [0, 0, 1, 1], [], []>} : vector<2x512xf32>, vector<512x16xf32>, vector<2x16xf32> -> vector<2x16xf32>
    %7 = arith.addf %3, %6 : vector<2x16xf32>
    %c0_6 = arith.constant 0 : index
    %c0_7 = arith.constant 0 : index
    %8 = vector.load %arg4[%c0_6, %c0_7] : memref<2x16xf32, #tpu.memory_space<vmem>>, vector<2x16xf32>
    tpu.vector_store %arg4[%c0_6, %c0_7], %7 {strides = array<i32>} : memref<2x16xf32, #tpu.memory_space<vmem>>, vector<2x16xf32>,
    return
  }
  func.func @transform_0(%arg0: i32) -> (i32, i32) {
    %c0_i32 = arith.constant 0 : i32
    %c0_i32_0 = arith.constant 0 : i32
    return %c0_i32, %arg0 : i32, i32
  }
  func.func @transform_1(%arg0: i32) -> (i32, i32) {
    %c0_i32 = arith.constant 0 : i32
    %c0_i32_0 = arith.constant 0 : i32
    return %arg0, %c0_i32 : i32, i32
  }
  func.func @transform_2(%arg0: i32) -> (i32, i32) {
    %c0_i32 = arith.constant 0 : i32
    %c0_i32_0 = arith.constant 0 : i32
    %c0_i32_1 = arith.constant 0 : i32
    return %c0_i32, %c0_i32_0 : i32, i32
  }
  func.func @transform_3(%arg0: i32) -> (i32, i32) {
    %c0_i32 = arith.constant 0 : i32
    %c0_i32_0 = arith.constant 0 : i32
    %c0_i32_1 = arith.constant 0 : i32
    return %c0_i32, %c0_i32_0 : i32, i32
  }
}

</mosaic_0001>

<bundles_post_ra>
// kernel: tpu_custom_call.1
= control target key start
LH: loop header
LB: loop body
LE: loop exit
PB: predicated region body
PF: predicated region fallthrough
CT: control target
= control target key end

     0   :  { %8 = vsyncpa [#allocation3], 0  ;;  %s500_s12 = smov 0   ;;  %s598_s0 = inlined_call_operand.vmem [shape: f32[2,1024], index: 0, kind: input, shape index: {}]   ;;  %s599_s1 = inlined_call_operand.vmem [shape: f32[1024,16], index: 1, kind: input, shape index: {}]   ;;  %s600_s2 = inlined_call_operand.vmem [shape: f32[1,16], index: 2, kind: input, shape index: {}]   ;;  %s601_s3 = inlined_call_operand.hbm [shape: f32[2,16], index: 3, kind: output, shape index: {}]  }
   0x1 LB: > { %s506_s13 = sadd.s32 4294967295, %s477_s12   ;;  %p413_p0 = scmp.ge.s32.totalorder %s477_s12, 1  ;;  %s477_s12 = sphi %s500_s12, %s14_s12  }
   0x2   : > { %p145_p1 = scmp.lt.s32.totalorder %s477_s12, 3 }
   0x4   : > { %p146_p2 = pnand %p413_p0, %p145_p1 }
   0x5   : > { %s414_s14 = sshll.u32 (!%p146_p2), %s506_s13, 2  ;;  %s416_s15 = sshll.u32 (!%p146_p2), %s506_s13, 6 }
   0x6   : > { %149 = sbr.rel (%p146_p2) target bundleno = 196 (0xc4), region = 32  ;;  %p170_p3 = scmp.lt.s32.totalorder (!%p146_p2), %s414_s14, 7 }
   0x7   : > { %p176_p4 = scmp.lt.s32.totalorder (!%p146_p2), %s416_s15, 127  ;;  %p418_p5 = scmp.ne.s32.totalorder (!%p146_p2), %s506_s13, 0 }
   0xb   : > { %s603_s14 = smov (!%p170_p3, %s414_s14), 7  ;;  %s605_s15 = smov (!%p176_p4, %s416_s15), 127 }
   0xc   : > { %s415_s16 = sshll.u32 %s603_s14, 1  ;;  %s417_s20 = sshll.u32 %s605_s15, 3 }
   0xd   : > { %s515_s19 = scalar_lea.vmem %s598_s0, %s415_s16  ;;  %s520_s23 = scalar_lea.vmem %s599_s1, %s417_s20 }
   0xe   : > { %184 = sbr.rel (%p418_p5) target bundleno = 21 (0x15), region = 36 }
  0x13   : > { %v438_v0 = vld [vmem:[%s600_s2] ss:$0 sm:$0xff]  ;;  %vm189_vm0 = vcmask 123904  }
  0x14   : > { %190 = vst.msk [vmem:[#allocation2] sm:$0x3] %vm189_vm0, %v438_v0 }
  0x15 PF: > { %v240_v1 = vld [vmem:[%s520_s23 + $0x178] sm:$0xff]  ;;  %v239_v2 = vld [vmem:[%s520_s23 + $0x170] sm:$0xff]  ;;  %v238_v6 = vld [vmem:[%s520_s23 + $0x168] sm:$0xff]  ;;  %s479_s26 = smov [#allocation2]   ;;  %s358_s30 = sshll.u32 %s601_s3, 4  ;;  %vm348_vm1 = vcmask 123904   ;;  %s359_s30 = int_to_ptr.hbm [resolvable:$true] %s358_s30 }
  0x16   : > { %v256_v3 = vld [vmem:[%s520_s23 + $0x1f8] sm:$0xff]  ;;  %307 = vmatpush.msra.mxu2 %v240_v1  ;;  %v255_v7 = vld [vmem:[%s520_s23 + $0x1f0] sm:$0xff]  ;;  %v254_v10 = vld [vmem:[%s520_s23 + $0x1e8] sm:$0xff]  ;;  %s356_s27 = sshll.u32 %s479_s26, 4  ;;  %p427_p6 = scmp.eq.s32.totalorder %s506_s13, 1  ;;  %s357_s27 = int_to_ptr.vmem [resolvable:$true] %s356_s27 }
  0x17   : > { %327 = vmatpush.msra.mxu3 %v256_v3  ;;  %v208_v4 = vld [vmem:[%s520_s23 + $0x78] sm:$0xff]  ;;  %v207_v8 = vld [vmem:[%s520_s23 + $0x70] sm:$0xff]  ;;  %v206_v11 = vld [vmem:[%s520_s23 + $0x68] sm:$0xff] }
  0x18   : > { %v224_v5 = vld [vmem:[%s520_s23 + $0xf8] sm:$0xff]  ;;  %267 = vmatpush.msra.mxu0 %v208_v4  ;;  %v223_v9 = vld [vmem:[%s520_s23 + $0xf0] sm:$0xff]  ;;  %308 = vmatpush.msra.mxu2 %v239_v2  ;;  %v237_v12 = vld [vmem:[%s520_s23 + $0x160] sm:$0xff] }
  0x19   : > { %287 = vmatpush.msra.mxu1 %v224_v5  ;;  %328 = vmatpush.msra.mxu3 %v255_v7  ;;  %v222_v13 = vld [vmem:[%s520_s23 + $0xe8] sm:$0xff]  ;;  %v253_v14 = vld [vmem:[%s520_s23 + $0x1e0] sm:$0xff]  ;;  %v236_v17 = vld [vmem:[%s520_s23 + $0x158] sm:$0xff] }
  0x1a   : > { %268 = vmatpush.msra.mxu0 %v207_v8  ;;  %309 = vmatpush.msra.mxu2 %v238_v6  ;;  %v205_v15 = vld [vmem:[%s520_s23 + $0x60] sm:$0xff]  ;;  %v252_v18 = vld [vmem:[%s520_s23 + $0x1d8] sm:$0xff]  ;;  %v235_v21 = vld [vmem:[%s520_s23 + $0x150] sm:$0xff] }
  0x1b   : > { %288 = vmatpush.msra.mxu1 %v223_v9  ;;  %329 = vmatpush.msra.mxu3 %v254_v10  ;;  %v221_v16 = vld [vmem:[%s520_s23 + $0xe0] sm:$0xff]  ;;  %v204_v19 = vld [vmem:[%s520_s23 + $0x58] sm:$0xff]  ;;  %v251_v22 = vld [vmem:[%s520_s23 + $0x1d0] sm:$0xff] }
  0x1c   : > { %269 = vmatpush.msra.mxu0 %v206_v11  ;;  %310 = vmatpush.msra.mxu2 %v237_v12  ;;  %v220_v20 = vld [vmem:[%s520_s23 + $0xd8] sm:$0xff]  ;;  %v203_v23 = vld [vmem:[%s520_s23 + $0x50] sm:$0xff]  ;;  %v234_v25 = vld [vmem:[%s520_s23 + $0x148] sm:$0xff] }
  0x1d   : > { %289 = vmatpush.msra.mxu1 %v222_v13  ;;  %330 = vmatpush.msra.mxu3 %v253_v14  ;;  %v219_v24 = vld [vmem:[%s520_s23 + $0xd0] sm:$0xff]  ;;  %v250_v26 = vld [vmem:[%s520_s23 + $0x1c8] sm:$0xff]  ;;  %v233_v29 = vld [vmem:[%s520_s23 + $0x140] sm:$0xff] }
  0x1e   : > { %270 = vmatpush.msra.mxu0 %v205_v15  ;;  %311 = vmatpush.msra.mxu2 %v236_v17  ;;  %v202_v27 = vld [vmem:[%s520_s23 + $0x48] sm:$0xff]  ;;  %v249_v30 = vld [vmem:[%s520_s23 + $0x1c0] sm:$0xff]  ;;  %v232_v33 = vld [vmem:[%s520_s23 + $0x138] sm:$0xff] }
  0x1f   : > { %290 = vmatpush.msra.mxu1 %v221_v16  ;;  %331 = vmatpush.msra.mxu3 %v252_v18  ;;  %v218_v28 = vld [vmem:[%s520_s23 + $0xc8] sm:$0xff]  ;;  %v201_v31 = vld [vmem:[%s520_s23 + $0x40] sm:$0xff]  ;;  %v248_v34 = vld [vmem:[%s520_s23 + $0x1b8] sm:$0xff] }
  0x20   : > { %271 = vmatpush.msra.mxu0 %v204_v19  ;;  %312 = vmatpush.msra.mxu2 %v235_v21  ;;  %v217_v32 = vld [vmem:[%s520_s23 + $0xc0] sm:$0xff]  ;;  %v200_v35 = vld [vmem:[%s520_s23 + $0x38] sm:$0xff]  ;;  %v231_v37 = vld [vmem:[%s520_s23 + $0x130] sm:$0xff] }
  0x21   : > { %291 = vmatpush.msra.mxu1 %v220_v20  ;;  %332 = vmatpush.msra.mxu3 %v251_v22  ;;  %v216_v36 = vld [vmem:[%s520_s23 + $0xb8] sm:$0xff]  ;;  %v247_v38 = vld [vmem:[%s520_s23 + $0x1b0] sm:$0xff]  ;;  %v230_v41 = vld [vmem:[%s520_s23 + $0x128] sm:$0xff] }
  0x22   : > { %272 = vmatpush.msra.mxu0 %v203_v23  ;;  %313 = vmatpush.msra.mxu2 %v234_v25  ;;  %v199_v39 = vld [vmem:[%s520_s23 + $0x30] sm:$0xff]  ;;  %v246_v42 = vld [vmem:[%s520_s23 + $0x1a8] sm:$0xff]  ;;  %v192_v45 = vld [vmem:[%s515_s19] sm:$0xff] }
  0x23   : > { %292 = vmatpush.msra.mxu1 %v219_v24  ;;  %333 = vmatpush.msra.mxu3 %v250_v26  ;;  %v215_v40 = vld [vmem:[%s520_s23 + $0xb0] sm:$0xff]  ;;  %v198_v43 = vld [vmem:[%s520_s23 + $0x28] sm:$0xff]  ;;  %v229_v46 = vld [vmem:[%s520_s23 + $0x120] sm:$0xff]  ;;  %258 = vst [vmem:[#allocation1] ss:$4 sm:$0xff] %v192_v45 }
  0x24   : > { %273 = vmatpush.msra.mxu0 %v202_v27  ;;  %314 = vmatpush.msra.mxu2 %v233_v29  ;;  %v214_v44 = vld [vmem:[%s520_s23 + $0xa8] sm:$0xff]  ;;  %v245_v47 = vld [vmem:[%s520_s23 + $0x1a0] sm:$0xff]  ;;  %v228_v50 = vld [vmem:[%s520_s23 + $0x118] sm:$0xff] }
  0x25   : > { %293 = vmatpush.msra.mxu1 %v218_v28  ;;  %334 = vmatpush.msra.mxu3 %v249_v30  ;;  %v197_v48 = vld [vmem:[%s520_s23 + $0x20] sm:$0xff]  ;;  %v244_v51 = vld [vmem:[%s520_s23 + $0x198] sm:$0xff]  ;;  %v227_v54 = vld [vmem:[%s520_s23 + $0x110] sm:$0xff] }
  0x26   : > { %274 = vmatpush.msra.mxu0 %v201_v31  ;;  %315 = vmatpush.msra.mxu2 %v232_v33  ;;  %v213_v49 = vld [vmem:[%s520_s23 + $0xa0] sm:$0xff]  ;;  %v196_v52 = vld [vmem:[%s520_s23 + $0x18] sm:$0xff]  ;;  %v243_v55 = vld [vmem:[%s520_s23 + $0x190] sm:$0xff] }
  0x27   : > { %294 = vmatpush.msra.mxu1 %v217_v32  ;;  %335 = vmatpush.msra.mxu3 %v248_v34  ;;  %v212_v53 = vld [vmem:[%s520_s23 + $0x98] sm:$0xff]  ;;  %v195_v56 = vld [vmem:[%s520_s23 + $0x10] sm:$0xff]  ;;  %v226_v58 = vld [vmem:[%s520_s23 + $0x108] sm:$0xff] }
  0x28   : > { %275 = vmatpush.msra.mxu0 %v200_v35  ;;  %316 = vmatpush.msra.mxu2 %v231_v37  ;;  %v211_v57 = vld [vmem:[%s520_s23 + $0x90] sm:$0xff]  ;;  %v242_v59 = vld [vmem:[%s520_s23 + $0x188] sm:$0xff]  ;;  %v225_v62 = vld [vmem:[%s520_s23 + $0x100] sm:$0xff] }
  0x29   : > { %295 = vmatpush.msra.mxu1 %v216_v36  ;;  %336 = vmatpush.msra.mxu3 %v247_v38  ;;  %v194_v60 = vld [vmem:[%s520_s23 + $0x8] sm:$0xff]  ;;  %v241_v63 = vld [vmem:[%s520_s23 + $0x180] sm:$0xff] }
  0x2a   : > { %276 = vmatpush.msra.mxu0 %v199_v39  ;;  %317 = vmatpush.msra.mxu2 %v230_v41  ;;  %v210_v61 = vld [vmem:[%s520_s23 + $0x88] sm:$0xff]  ;;  %v261_v0 = vld.sshfl [vmem:[#allocation1 + $0x10] sm:$0xff pattern:$0x73625140]  ;;  %v193_v2 = vld [vmem:[%s520_s23] sm:$0xff] }
  0x2b   : > { %296 = vmatpush.msra.mxu1 %v215_v40  ;;  %337 = vmatpush.msra.mxu3 %v246_v42  ;;  %v262_v1 = vld.sshfl [vmem:[#allocation1 + $0x18] sm:$0xff pattern:$0x73625140]  ;;  %v209_v3 = vld [vmem:[%s520_s23 + $0x80] sm:$0xff]  ;;  %v191_v12 = vld [vmem:[#allocation2] sm:$0x3] }
  0x2c   : > { %277 = vmatpush.msra.mxu0 %v198_v43  ;;  %318 = vmatpush.msra.mxu2 %v229_v46  ;;  %v259_v4 = vld.sshfl [vmem:[#allocation1] sm:$0xff pattern:$0x73625140]  ;;  %v260_v5 = vld.sshfl [vmem:[#allocation1 + $0x8] sm:$0xff pattern:$0x73625140] }
  0x2d   : > { %297 = vmatpush.msra.mxu1 %v214_v44  ;;  %338 = vmatpush.msra.mxu3 %v245_v47 }
  0x2e   : > { %278 = vmatpush.msra.mxu0 %v197_v48  ;;  %319 = vmatpush.msra.mxu2 %v228_v50 }
  0x2f   : > { %298 = vmatpush.msra.mxu1 %v213_v49  ;;  %339 = vmatpush.msra.mxu3 %v244_v51 }
  0x30   : > { %279 = vmatpush.msra.mxu0 %v196_v52  ;;  %320 = vmatpush.msra.mxu2 %v227_v54 }
  0x31   : > { %299 = vmatpush.msra.mxu1 %v212_v53  ;;  %340 = vmatpush.msra.mxu3 %v243_v55 }
  0x32   : > { %280 = vmatpush.msra.mxu0 %v195_v56  ;;  %321 = vmatpush.msra.mxu2 %v226_v58 }
  0x33   : > { %300 = vmatpush.msra.mxu1 %v211_v57  ;;  %341 = vmatpush.msra.mxu3 %v242_v59 }
  0x34   : > { %281 = vmatpush.msra.mxu0 %v194_v60  ;;  %322 = vmatpush.msra.mxu2 %v225_v62 }
  0x35   : > { %301 = vmatpush.msra.mxu1 %v210_v61  ;;  %342 = vmatpush.msra.mxu3 %v241_v63 }
  0x36   : > { %323 = vmatmul.f32.vlgmr.msra.gmra.mxu2 %v261_v0  ;;  %343 = vmatmul.f32.vlgmr.msra.gmra.mxu3 %v262_v1 }
  0x37   : > { %282 = vmatpush.msra.mxu0 %v193_v2  ;;  %302 = vmatpush.msra.mxu1 %v209_v3 }
  0x38   : > { %283 = vmatmul.f32.vlgmr.msra.gmra.mxu0 %v259_v4  ;;  %303 = vmatmul.f32.vlgmr.msra.gmra.mxu1 %v260_v5 }
  0xb5   : > { %v284_v6 = vpop.f32.mrf.mxu0  ;;  %v304_v7 = vpop.f32.mrf.mxu1 }
  0xb6   : > { %v305_v8 = vadd.f32 %v304_v7, %v284_v6 }
  0xb9   : > { %v324_v9 = vpop.f32.mrf.mxu2  ;;  %v344_v10 = vpop.f32.mrf.mxu3 }
  0xba   : > { %v325_v11 = vadd.f32 %v324_v9, %v305_v8 }
  0xbc   : > { %v345_v13 = vadd.f32 %v344_v10, %v325_v11 }
  0xbe   : > { %v347_v14 = vadd.f32 %v345_v13, %v191_v12 }
  0xc0   : > { %349 = vst.msk [vmem:[#allocation2] sm:$0x3] %vm348_vm1, %v347_v14 }
  0xc1   : > { %424 = dma.vmem_to_hbm [thread:$0]  (%p427_p6), %s357_s27, 32, %s359_s30, [#allocation3]  }
  0xc2   : > { %472 = dma.done.wait (%p427_p6), [#allocation3], 32  }
  0xc3   : > { %474 = vsyncadd (%p427_p6), [#allocation3], 4294967264 }
  0xc4 PF: > { %s14_s12 = sadd.s32 1, %s477_s12  }
  0xc5   : > { %p11_p7 = scmp.ge.s32.totalorder %s14_s12, 4  }
  0xc7   :  { %13 = sbr.rel (!%p11_p7) target bundleno = 1 (0x1), region = 66 }
  0xcc   :  { %372 = vsyncpa [#allocation3], 1 }
  0xcd   :  { %374 = vsyncpa [#allocation3 + $0x1], 1 }

</bundles_post_ra>
